<compile_context>
chip_gen: v6e
topology: v6e:2x2x1
jax: 0.10.0
libtpu: 0.0.40
codegen_flags: <defaults>
</compile_context>

<pallas_src>
import math

import jax
import jax.numpy as jnp
from jax import lax
from jax.experimental import pallas as pl
from jax.experimental.pallas import tpu as pltpu


def cross_attention_kernel(xt_ref, a_ref, wqt_ref, bq_ref, wkt_ref, bk_ref,
                           wv_ref, bv_ref, o_ref):
    """One grid step: `bb` batch elements x one lane-dense tile of N pixels.

    xt_ref : (bb, dq, TN)    image features, pre-transposed -> pixel axis = lanes
    a_ref  : (bb, S, da)     audio tokens
    wqt_ref: (dq, d_out)     W_Q^T, pre-scaled by 1/sqrt(d_out)
    bq_ref : (1,  d_out)     b_Q, pre-scaled
    wkt_ref: (da, d_out)     W_K^T
    bk_ref : (1,  d_out)
    wv_ref : (d_out, da)     W_V in its native nn.Linear layout
    bv_ref : (d_out, 1)
    o_ref  : (bb, d_out, TN) transposed output (lane-dense, unmasked stores)
    """
    wqt = wqt_ref[...]
    bq = bq_ref[...]
    wkt = wkt_ref[...]
    bk = bk_ref[...]
    wv = wv_ref[...]
    bv = bv_ref[...]
    contract_last = (((1,), (1,)), ((), ()))   # contract last dims, no batch dims

    # bb is a static block dim -> plain Python unroll; every matmul stays 2-D.
    for i in range(xt_ref.shape[0]):
        xt = xt_ref[i]                                   # (dq, TN)
        a = a_ref[i]                                     # (S, da)

        # K projection; V projection produced directly transposed (no in-kernel .T).
        k = jnp.dot(a, wkt, preferred_element_type=jnp.float32) + bk        # (S, d_out)
        v_t = lax.dot_general(wv, a, contract_last,
                              preferred_element_type=jnp.float32) + bv      # (d_out, S)

        # Fused Q projection + transposed scores (score scale folded into wqt/bq):
        #   scores_T = (K @ WqT_s) @ x_T + K @ bq_s^T                       (S, TN)
        kwq = lax.dot_general(k, wqt, contract_last,
                              preferred_element_type=jnp.float32)           # (S, dq)
        bias = lax.dot_general(k, bq, contract_last,
                               preferred_element_type=jnp.float32)          # (S, 1)
        scores_t = jnp.dot(kwq, xt, preferred_element_type=jnp.float32) + bias

        # Numerically-stable softmax over the key axis (axis 0 == sublanes, S=8
        # rows); every vreg here is lane-dense.  Exact divide: denom is a single
        # (1, TN) row so exactness is free (addresses review correctness note).
        m = jnp.max(scores_t, axis=0, keepdims=True)
        e = jnp.exp(scores_t - m)
        denom = jnp.sum(e, axis=0, keepdims=True)
        attn_t = e / denom                                                   # (S, TN)

        # out_T = V^T @ attn_T -> (d_out, TN): full-lane MXU columns + unmasked vst.
        o_ref[i] = jnp.dot(v_t, attn_t,
                           preferred_element_type=jnp.float32).astype(o_ref.dtype)


def prepare_cross_attention_params(params):
    """One-time parameter transforms (call at parameter-load time, not per step).

    params: (wq, bq, wk, bk, wv, bv) in nn.Linear layout (weight [out, in]).
    Folds the 1/sqrt(d_out) score scale into the Q-side weight/bias and
    pre-transposes the K/Q weights to [d_in, d_out].
    """
    wq, bq, wk, bk, wv, bv = params
    d_out = wq.shape[0]
    scale = 1.0 / math.sqrt(float(d_out))
    wqt_s = (wq * scale).T                    # (dq, d_out), pre-scaled
    bq_s = (bq * scale).reshape(1, d_out)     # pre-scaled
    wkt = wk.T                                # (da, d_out)
    bk2 = bk.reshape(1, d_out)
    wv2 = wv                                  # (d_out, da) kept native (used transposed)
    bv2 = bv.reshape(d_out, 1)
    return (wqt_s, bq_s, wkt, bk2, wv2, bv2)


def _tensorcores_per_chip():
    """Best-effort TensorCore count sharing one Pallas kernel invocation."""
    try:
        kind = jax.devices()[0].device_kind.lower()
    except Exception:
        return 1
    if "v7" in kind:
        return 2                    # v7x: 2 TCs per chip
    if "v4" in kind or "v5p" in kind or kind.strip() == "tpu v5":
        return 2                    # megacore generations
    return 1                        # v5e / v6e (and unknowns): single TensorCore


def cross_attention_block(x, audio_embed, prepared_params):
    """x: [B, H, W, d_query], audio_embed: [B, S, d_audio] -> [B, H*W, d_out]."""
    wqt_s, bq_s, wkt, bk2, wv2, bv2 = prepared_params
    B, H, W, dq = x.shape
    N = H * W
    _, S, da = audio_embed.shape
    d_out = wqt_s.shape[1]

    # Lane-dense layout: pixel axis (N, multiple of 128) becomes the lane axis
    # for scores / attn / output.  Pure layout plumbing in the wrapper.
    x_t = x.reshape(B, N, dq).transpose(0, 2, 1)            # (B, dq, N)

    # Grid choice per generation:
    #  * single-TC (v5e/v6e): one step over the whole batch -> no per-step
    #    overhead; whole working set <1 MiB vs 128 MiB VMEM.
    #  * multi-TC (v7x): one batch element x 128-pixel tiles per step so each
    #    core gets >=2 steps and the output writeback DMA overlaps compute.
    if _tensorcores_per_chip() > 1 and N % 128 == 0 and N >= 256:
        bb, tn = 1, 128
    else:
        bb, tn = B, N
    grid = (B // bb, N // tn)

    out_dtype = x.dtype    # emit in input dtype (bf16 in -> bf16 out)

    out_t = pl.pallas_call(
        cross_attention_kernel,
        out_shape=jax.ShapeDtypeStruct((B, d_out, N), out_dtype),
        grid_spec=pltpu.PrefetchScalarGridSpec(
            num_scalar_prefetch=0,
            grid=grid,
            in_specs=[
                pl.BlockSpec((bb, dq, tn), lambda b, n: (b, 0, n)),   # x^T tile
                pl.BlockSpec((bb, S, da), lambda b, n: (b, 0, 0)),    # audio
                pl.BlockSpec((dq, d_out), lambda b, n: (0, 0)),       # W_Q^T (scaled)
                pl.BlockSpec((1, d_out), lambda b, n: (0, 0)),        # b_Q   (scaled)
                pl.BlockSpec((da, d_out), lambda b, n: (0, 0)),       # W_K^T
                pl.BlockSpec((1, d_out), lambda b, n: (0, 0)),        # b_K
                pl.BlockSpec((d_out, da), lambda b, n: (0, 0)),       # W_V (native)
                pl.BlockSpec((d_out, 1), lambda b, n: (0, 0)),        # b_V (column)
            ],
            out_specs=pl.BlockSpec((bb, d_out, tn), lambda b, n: (b, 0, n)),
        ),
        compiler_params=pltpu.CompilerParams(
            dimension_semantics=("parallel", "parallel")),
    )(x_t, audio_embed, wqt_s, bq_s, wkt, bk2, wv2, bv2)

    # Un-transpose to the module's [batch, h*w, d_out] contract (wrapper-side
    # layout plumbing; consumers that accept (B, d_out, N) can skip this).
    return out_t.transpose(0, 2, 1)


def reference(x, audio_embed, params):
    """Plain-JAX replica of the PyTorch forward for verification."""
    wq, bq, wk, bk, wv, bv = params
    B, H, W, dq = x.shape
    xf = x.reshape(B, H * W, dq)
    Q = xf @ wq.T + bq
    K = audio_embed @ wk.T + bk
    V = audio_embed @ wv.T + bv
    scores = jnp.einsum("bnd,bsd->bns", Q, K) / math.sqrt(K.shape[-1])
    attn = jax.nn.softmax(scores, axis=-1)
    return jnp.einsum("bns,bsd->bnd", attn, V)


if __name__ == "__main__":
    # Small shapes consistent with the module's forward.
    B, H, W = 2, 16, 16            # image features: [B, H, W, d_query]
    d_query, d_audio, d_out = 4, 16, 32
    S = 8                          # audio seq_len

    key = jax.random.PRNGKey(0)
    kx, ka, k1, k2, k3, k4, k5, k6 = jax.random.split(key, 8)

    x = jax.random.normal(kx, (B, H, W, d_query), dtype=jnp.float32)
    audio_embed = jax.random.normal(ka, (B, S, d_audio), dtype=jnp.float32)

    # Deterministic nn.Linear-style parameters (weight: [out, in], bias: [out]).
    def linear_init(kw, kb, d_in, d_o):
        lim = 1.0 / math.sqrt(d_in)
        w = jax.random.uniform(kw, (d_o, d_in), jnp.float32, -lim, lim)
        b = jax.random.uniform(kb, (d_o,), jnp.float32, -lim, lim)
        return w, b

    wq, bq = linear_init(k1, k2, d_query, d_out)
    wk, bk = linear_init(k3, k4, d_audio, d_out)
    wv, bv = linear_init(k5, k6, d_audio, d_out)
    params = (wq, bq, wk, bk, wv, bv)

    # One-time parameter prep (init time), jitted forward (wrapper transposes fuse).
    prepared = prepare_cross_attention_params(params)
    fwd = jax.jit(cross_attention_block)

    out = fwd(x, audio_embed, prepared)
    out = jax.block_until_ready(out)

    ref = reference(x, audio_embed, params)
    assert out.shape == (B, H * W, d_out), out.shape
    # Exact softmax divide now; remaining error is f32 summation-order only
    # (Q fused into the score matmul), well under 5e-4.
    max_err = float(jnp.max(jnp.abs(out - ref)))
    assert jnp.allclose(out, ref, rtol=5e-4, atol=5e-4), max_err

    print("KERNEL_OK")
</pallas_src>

<mosaic_0001>
module attributes {stable_mosaic.version = 11 : i64} {
  func.func @cross_attention_kernel(%arg0: i32, %arg1: i32, %arg2: memref<2x4x256xf32, #tpu.memory_space<vmem>>, %arg3: memref<2x8x16xf32, #tpu.memory_space<vmem>>, %arg4: memref<4x32xf32, #tpu.memory_space<vmem>>, %arg5: memref<1x32xf32, #tpu.memory_space<vmem>>, %arg6: memref<16x32xf32, #tpu.memory_space<vmem>>, %arg7: memref<1x32xf32, #tpu.memory_space<vmem>>, %arg8: memref<32x16xf32, #tpu.memory_space<vmem>>, %arg9: memref<32x1xf32, #tpu.memory_space<vmem>>, %arg10: memref<2x32x256xf32, #tpu.memory_space<vmem>>) attributes {dimension_semantics = [#tpu.dimension_semantics<parallel>, #tpu.dimension_semantics<parallel>], iteration_bounds = array<i64: 1, 1>, scalar_prefetch = 0 : i64, scratch_operands = 0 : i64, tpu.core_type = #tpu.core_type<tc>, window_params = [{transform_indices = @transform_0, window_bounds = array<i64: 2, 4, 256>}, {transform_indices = @transform_1, window_bounds = array<i64: 2, 8, 16>}, {pipeline_mode = #tpu.pipeline_mode<synchronous>, transform_indices = @transform_2, window_bounds = array<i64: 4, 32>}, {pipeline_mode = #tpu.pipeline_mode<synchronous>, transform_indices = @transform_3, window_bounds = array<i64: 1, 32>}, {pipeline_mode = #tpu.pipeline_mode<synchronous>, transform_indices = @transform_4, window_bounds = array<i64: 16, 32>}, {pipeline_mode = #tpu.pipeline_mode<synchronous>, transform_indices = @transform_5, window_bounds = array<i64: 1, 32>}, {pipeline_mode = #tpu.pipeline_mode<synchronous>, transform_indices = @transform_6, window_bounds = array<i64: 32, 16>}, {pipeline_mode = #tpu.pipeline_mode<synchronous>, transform_indices = @transform_7, window_bounds = array<i64: 32, 1>}, {transform_indices = @transform_8, window_bounds = array<i64: 2, 32, 256>}]} {
    %c0 = arith.constant 0 : index
    %c0_0 = arith.constant 0 : index
    %0 = vector.load %arg4[%c0, %c0_0] : memref<4x32xf32, #tpu.memory_space<vmem>>, vector<4x32xf32>
    %c0_1 = arith.constant 0 : index
    %c0_2 = arith.constant 0 : index
    %1 = vector.load %arg5[%c0_1, %c0_2] : memref<1x32xf32, #tpu.memory_space<vmem>>, vector<1x32xf32>
    %c0_3 = arith.constant 0 : index
    %c0_4 = arith.constant 0 : index
    %2 = vector.load %arg6[%c0_3, %c0_4] : memref<16x32xf32, #tpu.memory_space<vmem>>, vector<16x32xf32>
    %c0_5 = arith.constant 0 : index
    %c0_6 = arith.constant 0 : index
    %3 = vector.load %arg7[%c0_5, %c0_6] : memref<1x32xf32, #tpu.memory_space<vmem>>, vector<1x32xf32>
    %c0_7 = arith.constant 0 : index
    %c0_8 = arith.constant 0 : index
    %4 = vector.load %arg8[%c0_7, %c0_8] : memref<32x16xf32, #tpu.memory_space<vmem>>, vector<32x16xf32>
    %c0_9 = arith.constant 0 : index
    %c0_10 = arith.constant 0 : index
    %5 = vector.load %arg9[%c0_9, %c0_10] : memref<32x1xf32, #tpu.memory_space<vmem>>, vector<32x1xf32>
    %c0_11 = arith.constant 0 : index
    %c0_12 = arith.constant 0 : index
    %c0_13 = arith.constant 0 : index
    %6 = vector.load %arg2[%c0_11, %c0_12, %c0_13] : memref<2x4x256xf32, #tpu.memory_space<vmem>>, vector<1x4x256xf32>
    %7 = vector.shape_cast %6 : vector<1x4x256xf32> to vector<4x256xf32>
    %c0_14 = arith.constant 0 : index
    %c0_15 = arith.constant 0 : index
    %c0_16 = arith.constant 0 : index
    %8 = vector.load %arg3[%c0_14, %c0_15, %c0_16] : memref<2x8x16xf32, #tpu.memory_space<vmem>>, vector<1x8x16xf32>
    %9 = vector.shape_cast %8 : vector<1x8x16xf32> to vector<8x16xf32>
    %cst = arith.constant dense<0.000000e+00> : vector<8x32xf32>
    %10 = tpu.matmul %9, %2, %cst {dimension_numbers = #tpu.dot_dimension_numbers<[1], [0], [0], [1], [0, 0, 1, 1], [], []>} : vector<8x16xf32>, vector<16x32xf32>, vector<8x32xf32> -> vector<8x32xf32>
    %11 = vector.broadcast %3 : vector<1x32xf32> to vector<8x32xf32>
    %12 = arith.addf %10, %11 : vector<8x32xf32>
    %cst_17 = arith.constant dense<0.000000e+00> : vector<32x8xf32>
    %13 = tpu.matmul %4, %9, %cst_17 {dimension_numbers = #tpu.dot_dimension_numbers<[1], [1], [0], [0], [0, 0, 1, 0], [], []>} : vector<32x16xf32>, vector<8x16xf32>, vector<32x8xf32> -> vector<32x8xf32>
    %14 = vector.broadcast %5 : vector<32x1xf32> to vector<32x8xf32>
    %15 = arith.addf %13, %14 : vector<32x8xf32>
    %cst_18 = arith.constant dense<0.000000e+00> : vector<8x4xf32>
    %16 = tpu.matmul %12, %0, %cst_18 {dimension_numbers = #tpu.dot_dimension_numbers<[1], [1], [0], [0], [0, 0, 1, 0], [], []>} : vector<8x32xf32>, vector<4x32xf32>, vector<8x4xf32> -> vector<8x4xf32>
    %cst_19 = arith.constant dense<0.000000e+00> : vector<8x1xf32>
    %17 = tpu.matmul %12, %1, %cst_19 {dimension_numbers = #tpu.dot_dimension_numbers<[1], [1], [0], [0], [0, 0, 1, 0], [], []>} : vector<8x32xf32>, vector<1x32xf32>, vector<8x1xf32> -> vector<8x1xf32>
    %cst_20 = arith.constant dense<0.000000e+00> : vector<8x256xf32>
    %18 = tpu.matmul %16, %7, %cst_20 {dimension_numbers = #tpu.dot_dimension_numbers<[1], [0], [0], [1], [0, 0, 1, 1], [], []>} : vector<8x4xf32>, vector<4x256xf32>, vector<8x256xf32> -> vector<8x256xf32>
    %19 = vector.broadcast %17 : vector<8x1xf32> to vector<8x256xf32>
    %20 = arith.addf %18, %19 : vector<8x256xf32>
    %cst_21 = arith.constant dense<0xFF800000> : vector<256xf32>
    %21 = vector.multi_reduction <maximumf>, %20, %cst_21 [0] : vector<8x256xf32> to vector<256xf32>
    %22 = vector.shape_cast %21 : vector<256xf32> to vector<1x256xf32>
    %23 = vector.broadcast %22 : vector<1x256xf32> to vector<8x256xf32>
    %24 = arith.subf %20, %23 : vector<8x256xf32>
    %25 = math.exp %24 : vector<8x256xf32>
    %cst_22 = arith.constant dense<0.000000e+00> : vector<256xf32>
    %26 = vector.multi_reduction <add>, %25, %cst_22 [0] : vector<8x256xf32> to vector<256xf32>
    %27 = vector.shape_cast %26 : vector<256xf32> to vector<1x256xf32>
    %28 = vector.broadcast %27 : vector<1x256xf32> to vector<8x256xf32>
    %29 = arith.divf %25, %28 : vector<8x256xf32>
    %cst_23 = arith.constant dense<0.000000e+00> : vector<32x256xf32>
    %30 = tpu.matmul %15, %29, %cst_23 {dimension_numbers = #tpu.dot_dimension_numbers<[1], [0], [0], [1], [0, 0, 1, 1], [], []>} : vector<32x8xf32>, vector<8x256xf32>, vector<32x256xf32> -> vector<32x256xf32>
    %c0_24 = arith.constant 0 : index
    %c0_25 = arith.constant 0 : index
    %c0_26 = arith.constant 0 : index
    %31 = vector.load %arg10[%c0_24, %c0_25, %c0_26] : memref<2x32x256xf32, #tpu.memory_space<vmem>>, vector<1x32x256xf32>
    %32 = vector.shape_cast %31 : vector<1x32x256xf32> to vector<32x256xf32>
    %33 = vector.shape_cast %30 : vector<32x256xf32> to vector<1x32x256xf32>
    tpu.vector_store %arg10[%c0_24, %c0_25, %c0_26], %33 {strides = array<i32>} : memref<2x32x256xf32, #tpu.memory_space<vmem>>, vector<1x32x256xf32>,
    %c1 = arith.constant 1 : index
    %c0_27 = arith.constant 0 : index
    %c0_28 = arith.constant 0 : index
    %34 = vector.load %arg2[%c1, %c0_27, %c0_28] : memref<2x4x256xf32, #tpu.memory_space<vmem>>, vector<1x4x256xf32>
    %35 = vector.shape_cast %34 : vector<1x4x256xf32> to vector<4x256xf32>
    %c1_29 = arith.constant 1 : index
    %c0_30 = arith.constant 0 : index
    %c0_31 = arith.constant 0 : index
    %36 = vector.load %arg3[%c1_29, %c0_30, %c0_31] : memref<2x8x16xf32, #tpu.memory_space<vmem>>, vector<1x8x16xf32>
    %37 = vector.shape_cast %36 : vector<1x8x16xf32> to vector<8x16xf32>
    %cst_32 = arith.constant dense<0.000000e+00> : vector<8x32xf32>
    %38 = tpu.matmul %37, %2, %cst_32 {dimension_numbers = #tpu.dot_dimension_numbers<[1], [0], [0], [1], [0, 0, 1, 1], [], []>} : vector<8x16xf32>, vector<16x32xf32>, vector<8x32xf32> -> vector<8x32xf32>
    %39 = vector.broadcast %3 : vector<1x32xf32> to vector<8x32xf32>
    %40 = arith.addf %38, %39 : vector<8x32xf32>
    %cst_33 = arith.constant dense<0.000000e+00> : vector<32x8xf32>
    %41 = tpu.matmul %4, %37, %cst_33 {dimension_numbers = #tpu.dot_dimension_numbers<[1], [1], [0], [0], [0, 0, 1, 0], [], []>} : vector<32x16xf32>, vector<8x16xf32>, vector<32x8xf32> -> vector<32x8xf32>
    %42 = vector.broadcast %5 : vector<32x1xf32> to vector<32x8xf32>
    %43 = arith.addf %41, %42 : vector<32x8xf32>
    %cst_34 = arith.constant dense<0.000000e+00> : vector<8x4xf32>
    %44 = tpu.matmul %40, %0, %cst_34 {dimension_numbers = #tpu.dot_dimension_numbers<[1], [1], [0], [0], [0, 0, 1, 0], [], []>} : vector<8x32xf32>, vector<4x32xf32>, vector<8x4xf32> -> vector<8x4xf32>
    %cst_35 = arith.constant dense<0.000000e+00> : vector<8x1xf32>
    %45 = tpu.matmul %40, %1, %cst_35 {dimension_numbers = #tpu.dot_dimension_numbers<[1], [1], [0], [0], [0, 0, 1, 0], [], []>} : vector<8x32xf32>, vector<1x32xf32>, vector<8x1xf32> -> vector<8x1xf32>
    %cst_36 = arith.constant dense<0.000000e+00> : vector<8x256xf32>
    %46 = tpu.matmul %44, %35, %cst_36 {dimension_numbers = #tpu.dot_dimension_numbers<[1], [0], [0], [1], [0, 0, 1, 1], [], []>} : vector<8x4xf32>, vector<4x256xf32>, vector<8x256xf32> -> vector<8x256xf32>
    %47 = vector.broadcast %45 : vector<8x1xf32> to vector<8x256xf32>
    %48 = arith.addf %46, %47 : vector<8x256xf32>
    %cst_37 = arith.constant dense<0xFF800000> : vector<256xf32>
    %49 = vector.multi_reduction <maximumf>, %48, %cst_37 [0] : vector<8x256xf32> to vector<256xf32>
    %50 = vector.shape_cast %49 : vector<256xf32> to vector<1x256xf32>
    %51 = vector.broadcast %50 : vector<1x256xf32> to vector<8x256xf32>
    %52 = arith.subf %48, %51 : vector<8x256xf32>
    %53 = math.exp %52 : vector<8x256xf32>
    %cst_38 = arith.constant dense<0.000000e+00> : vector<256xf32>
    %54 = vector.multi_reduction <add>, %53, %cst_38 [0] : vector<8x256xf32> to vector<256xf32>
    %55 = vector.shape_cast %54 : vector<256xf32> to vector<1x256xf32>
    %56 = vector.broadcast %55 : vector<1x256xf32> to vector<8x256xf32>
    %57 = arith.divf %53, %56 : vector<8x256xf32>
    %cst_39 = arith.constant dense<0.000000e+00> : vector<32x256xf32>
    %58 = tpu.matmul %43, %57, %cst_39 {dimension_numbers = #tpu.dot_dimension_numbers<[1], [0], [0], [1], [0, 0, 1, 1], [], []>} : vector<32x8xf32>, vector<8x256xf32>, vector<32x256xf32> -> vector<32x256xf32>
    %c1_40 = arith.constant 1 : index
    %c0_41 = arith.constant 0 : index
    %c0_42 = arith.constant 0 : index
    %59 = vector.load %arg10[%c1_40, %c0_41, %c0_42] : memref<2x32x256xf32, #tpu.memory_space<vmem>>, vector<1x32x256xf32>
    %60 = vector.shape_cast %59 : vector<1x32x256xf32> to vector<32x256xf32>
    %61 = vector.shape_cast %58 : vector<32x256xf32> to vector<1x32x256xf32>
    tpu.vector_store %arg10[%c1_40, %c0_41, %c0_42], %61 {strides = array<i32>} : memref<2x32x256xf32, #tpu.memory_space<vmem>>, vector<1x32x256xf32>,
    return
  }
  func.func @transform_0(%arg0: i32, %arg1: i32) -> (i32, i32, i32) {
    %c0_i32 = arith.constant 0 : i32
    %c0_i32_0 = arith.constant 0 : i32
    return %arg0, %c0_i32, %arg1 : i32, i32, i32
  }
  func.func @transform_1(%arg0: i32, %arg1: i32) -> (i32, i32, i32) {
    %c0_i32 = arith.constant 0 : i32
    %c0_i32_0 = arith.constant 0 : i32
    %c0_i32_1 = arith.constant 0 : i32
    return %arg0, %c0_i32, %c0_i32_0 : i32, i32, i32
  }
  func.func @transform_2(%arg0: i32, %arg1: i32) -> (i32, i32) {
    %c0_i32 = arith.constant 0 : i32
    %c0_i32_0 = arith.constant 0 : i32
    %c0_i32_1 = arith.constant 0 : i32
    return %c0_i32, %c0_i32_0 : i32, i32
  }
  func.func @transform_3(%arg0: i32, %arg1: i32) -> (i32, i32) {
    %c0_i32 = arith.constant 0 : i32
    %c0_i32_0 = arith.constant 0 : i32
    %c0_i32_1 = arith.constant 0 : i32
    return %c0_i32, %c0_i32_0 : i32, i32
  }
  func.func @transform_4(%arg0: i32, %arg1: i32) -> (i32, i32) {
    %c0_i32 = arith.constant 0 : i32
    %c0_i32_0 = arith.constant 0 : i32
    %c0_i32_1 = arith.constant 0 : i32
    return %c0_i32, %c0_i32_0 : i32, i32
  }
  func.func @transform_5(%arg0: i32, %arg1: i32) -> (i32, i32) {
    %c0_i32 = arith.constant 0 : i32
    %c0_i32_0 = arith.constant 0 : i32
    %c0_i32_1 = arith.constant 0 : i32
    return %c0_i32, %c0_i32_0 : i32, i32
  }
  func.func @transform_6(%arg0: i32, %arg1: i32) -> (i32, i32) {
    %c0_i32 = arith.constant 0 : i32
    %c0_i32_0 = arith.constant 0 : i32
    %c0_i32_1 = arith.constant 0 : i32
    return %c0_i32, %c0_i32_0 : i32, i32
  }
  func.func @transform_7(%arg0: i32, %arg1: i32) -> (i32, i32) {
    %c0_i32 = arith.constant 0 : i32
    %c0_i32_0 = arith.constant 0 : i32
    %c0_i32_1 = arith.constant 0 : i32
    return %c0_i32, %c0_i32_0 : i32, i32
  }
  func.func @transform_8(%arg0: i32, %arg1: i32) -> (i32, i32, i32) {
    %c0_i32 = arith.constant 0 : i32
    %c0_i32_0 = arith.constant 0 : i32
    return %arg0, %c0_i32, %arg1 : i32, i32, i32
  }
}

</mosaic_0001>

<bundles_post_ra>
// kernel: cross_attention_block.1
= control target key start
LH: loop header
LB: loop body
LE: loop exit
PB: predicated region body
PF: predicated region fallthrough
CT: control target
= control target key end

     0   :  { %v1176_v1 = vmov 0.0   ;;  %vm1177_vm0 = vmmov 0   ;;  %vm51_vm1 = vcmask 130048   ;;  %s1376_s0 = inlined_call_operand.vmem [shape: f32[2,4,256], index: 0, kind: input, shape index: {}]   ;;  %s1377_s1 = inlined_call_operand.vmem [shape: f32[2,8,16], index: 1, kind: input, shape index: {}]   ;;  %s1378_s2 = inlined_call_operand.vmem [shape: f32[4,32], index: 2, kind: input, shape index: {}]   ;;  %s1379_s3 = inlined_call_operand.vmem [shape: f32[1,32], index: 3, kind: input, shape index: {}]   ;;  %s1380_s4 = inlined_call_operand.vmem [shape: f32[16,32], index: 4, kind: input, shape index: {}]   ;;  %s1381_s5 = inlined_call_operand.vmem [shape: f32[1,32], index: 5, kind: input, shape index: {}]   ;;  %s1382_s6 = inlined_call_operand.vmem [shape: f32[32,16], index: 6, kind: input, shape index: {}]   ;;  %s1383_s7 = inlined_call_operand.vmem [shape: f32[32,1], index: 7, kind: input, shape index: {}]   ;;  %s1384_s8 = inlined_call_operand.hbm [shape: f32[2,32,256], index: 8, kind: output, shape index: {}]  }
   0x1   :  { %v33_v0 = vld [vmem:[%s1380_s4 + $0x8] sm:$0xff]  ;;  %1088 = vmatprep.subr.mxu0 %v1176_v1  ;;  %v32_v2 = vld [vmem:[%s1380_s4] sm:$0xff]  ;;  %1092 = vmatprep.mubr.msk.f32.mxu0 %vm1177_vm0, %v1176_v1 }
   0x2   :  { %v44_v3 = vld [vmem:[%s1377_s1] sm:$0xff] }
   0x3   :  { %13 = vsyncpa [#allocation3], 0  ;;  %1089 = vmatpush3.msra.mxu0 %v33_v0  ;;  %1095 = vmatprep.subr.msk.mxu1 %vm51_vm1, %v44_v3  ;;  %v30_v4 = vld [vmem:[%s1378_s2] sm:$0xf]  ;;  %vm242_vm2 = vcmask 261120   ;;  %vm335_vm3 = vcmask 1043456  }
   0x4   :  { %1090 = vmatprep.subr.mxu0 %v1176_v1  ;;  %1096 = vmatpush3.xpose.msk.msra.mxu1 %vm51_vm1, %v44_v3  ;;  %v1034_v5 = vld [vmem:[%s1381_s5] ss:$0 sm:$0xff]  ;;  %v1273_v15 = vld [vmem:[%s1382_s6 + $0x8] sm:$0xff]  ;;  %v1278_v16 = vld [vmem:[%s1382_s6 + $0x10] sm:$0xff]  ;;  %v1178_v17 = vmov 0   ;;  %vm331_vm4 = vcmask 31744  }
   0x5   :  { %1091 = vmatpush3.msra.mxu0 %v32_v2  ;;  %v1043_v7 = vld [vmem:[%s1379_s3] ss:$0 sm:$0xff]  ;;  %1134 = vset.pattern.permute.xlu0 %v1178_v17  ;;  %v40_v19 = vld [vmem:[%s1383_s7 + $0x8] sm:$0xff]  ;;  %v1295_v20 = vld [vmem:[%s1382_s6 + $0x18] sm:$0xff]  ;;  %vm445_vm5 = vcmask 64512  }
   0x6   :  { %1093 = vmatmul.mubr.msk.f32.vlgmr.msra.gmra.mxu0 %vm51_vm1, %v44_v3  ;;  %1103 = vmatprep.subr.mxu0 %v1176_v1  ;;  %v43_v12 = vld [vmem:[%s1376_s0] sm:$0xff]  ;;  %v41_v21 = vld [vmem:[%s1383_s7 + $0x10] sm:$0xff]  ;;  %v42_v22 = vld [vmem:[%s1383_s7 + $0x18] sm:$0xff] }
   0x7   :  { %1105 = vmatprep.mubr.msk.f32.mxu0 %vm1177_vm0, %v1176_v1  ;;  %1104 = vmatpush3.xpose.msk.msra.mxu0 %vm242_vm2, %v30_v4  ;;  %v330_v13 = vcombine.high %v43_v12, %v43_v12  ;;  %v1268_v14 = vld [vmem:[%s1382_s6] sm:$0xff]  ;;  %v1312_v25 = vld [vmem:[%s1377_s1 + $0x8] sm:$0xff] }
   0x8   :  { %1097 = vmatprep.mubr.msk.f32.mxu1 %vm51_vm1, %v1268_v14  ;;  %v39_v18 = vld [vmem:[%s1383_s7] sm:$0xff]  ;;  %1135 = vset.pattern.permute.xlu1 %v1178_v17 }
   0x9   :  { %1044 = vmatprep.subr.msk.mxu0 %vm335_vm3, %v330_v13  ;;  %1098 = vmatmul.mubr.msk.f32.vlgmr.msra.gmra.mxu1 %vm51_vm1, %v1273_v15 }
   0xa   :  { %1100 = vmatprep.mubr.msk.f32.mxu1 %vm51_vm1, %v1278_v16  ;;  %132 = vperm.xlu1 %1135, %v40_v19  }
   0xd   :  { %1101 = vmatmul.mubr.msk.f32.gmra.mxu1 %vm51_vm1, %v1295_v20 }
   0xe   :  { %522 = vmatprep.mubr.f32.mxu1 %v1176_v1  ;;  %137 = vperm.xlu1 %1135, %v41_v21  }
  0x12   :  { %142 = vperm.xlu1 %1135, %v42_v22  }
  0xc6   :  { %v121_v6 = vpop.f32.mrf.mxu0 }
  0xc7   :  { %v122_v8 = vadd.f32 %v1034_v5, %v121_v6  ;;  %v1326_v6 = vpop.permute.xlu1 %132 }
  0xc8   :  { %v1094_v9 = vpop.f32.mrf.mxu0 }
  0xc9   :  { %1106 = vmatmul.mubr.msk.f32.vlgmr.msra.gmra.mxu0 %vm242_vm2, %v122_v8  ;;  %v325_v10 = vmul.f32 %v1043_v7, %v122_v8  ;;  %v1099_v3 = vpop.f32.mrf.mxu1  ;;  %v1051_v9 = vld [vmem:[%s1376_s0 + $0x8] sm:$0xff]  ;;  %s1179_s0 = smov [#allocation2]  }
  0xca   :  { %404 = vmatprep.mubr.f32.mxu0 %v1176_v1  ;;  %1045 = vmatpush1.msk.msra.mxu0 %vm335_vm3, %v43_v12  ;;  %v795_v17 = vcombine.high %v1051_v9, %v1051_v9  ;;  %v229_v19 = vadd.f32 %v1099_v3, %v1326_v6  ;;  %s1023_s10 = sshll.u32 %s1179_s0, 4  ;;  %s1024_s10 = int_to_ptr.vmem [resolvable:$true] %s1023_s10 }
  0xcb   :  { %v326_v11 = vsel %vm242_vm2, %v325_v10, 0.0  ;;  %1108 = vmatprep.subr.mxu0 %v1176_v1  ;;  %s1154_s4 = scalar_lea.vmem %s1024_s10, 2048  ;;  %p1159_p1 = scmp.lt.s32.totalorder %s1024_s10, %s1024_s10 }
  0xcc   :  { %327 = vadd.xlane.f32.xlu0 %v326_v11  ;;  %p1155_p0 = scmp.ne.s32.totalorder %s1024_s10, %s1154_s4  ;;  %p1160_p2 = scmp.lt.s32.totalorder %s1154_s4, %s1154_s4 }
  0xce   :  { %p1161_p3 = por %p1160_p2, %p1159_p1 }
  0xd0   :  { %p1162_p4 = pnand %p1161_p3, %p1155_p0 }
  0xe2   :  { %127 = vperm.xlu0 %1134, %v39_v18   ;;  %v1332_v18 = vpop.permute.xlu1 %137 }
 0x155   :  { %v328_v26 = vpop.xlane.xlu0 %327 }
 0x189   :  { %v315_v23 = vpop.f32.mrf.mxu0 }
 0x18a   :  { %1046 = vmatmul.mubr.msk.f32.vlgmr.msra.gmra.mxu0 %vm331_vm4, %v315_v23  ;;  %v1345_v23 = vpop.permute.xlu1 %142 }
 0x18b   :  { %v1107_v24 = vpop.f32.mrf.mxu0  ;;  %1109 = vmatpush3.msra.mxu0 %v33_v0  ;;  %1112 = vmatprep.mubr.msk.f32.mxu0 %vm1177_vm0, %v1176_v1 }
 0x18c   :  { %1110 = vmatprep.subr.mxu0 %v1176_v1 }
 0x18d   :  { %1111 = vmatpush3.msra.mxu0 %v32_v2 }
 0x18e   :  { %1113 = vmatmul.mubr.msk.f32.vlgmr.msra.gmra.mxu0 %vm51_vm1, %v1312_v25  ;;  %1123 = vmatprep.subr.mxu0 %v1176_v1 }
 0x18f   :  { %1124 = vmatpush3.xpose.msk.msra.mxu0 %vm242_vm2, %v30_v4  ;;  %1125 = vmatprep.mubr.msk.f32.mxu0 %vm1177_vm0, %v1176_v1  ;;  %v1324_v4 = vpop.permute.xlu0 %127 }
 0x24a   :  { %v406_v27 = vpop.f32.mrf.mxu0 }
 0x24b   :  { %v407_v28 = vadd.f32 %v406_v27, %v328_v26 }
 0x24c   :  { %v408_v29 = vpop.f32.mrf.mxu0 }
 0x24d   :  { %v411_v30 = vrot.slane %v407_v28, 4  ;;  %v409_v31 = vadd.f32 %v408_v29, %v328_v26 }
 0x24e   :  { %v628_v32 = vpop.f32.mrf.mxu0 }
 0x24f   :  { %v412_v33 = vmax.f32 %v407_v28, %v411_v30  ;;  %v417_v34 = vrot.slane %v409_v31, 4  ;;  %v629_v35 = vadd.f32 %v1034_v5, %v628_v32  ;;  %v223_v5 = vpop.f32.mrf.mxu1 }
 0x250   :  { %v1114_v36 = vpop.f32.mrf.mxu0  ;;  %v224_v10 = vadd.f32 %v223_v5, %v1324_v4 }
 0x251   :  { %v413_v37 = vrot.slane %v412_v33, 2  ;;  %v418_v38 = vmax.f32 %v409_v31, %v417_v34  ;;  %1126 = vmatmul.mubr.msk.f32.vlgmr.msra.gmra.mxu0 %vm242_vm2, %v629_v35  ;;  %v790_v39 = vmul.f32 %v1043_v7, %v629_v35  ;;  %v1102_v13 = vpop.f32.mrf.mxu1 }
 0x252   :  { %984 = vmatprep.mubr.f32.mxu0 %v1176_v1  ;;  %v239_v24 = vadd.f32 %v1102_v13, %v1345_v23 }
 0x253   :  { %v414_v40 = vmax.f32 %v412_v33, %v413_v37  ;;  %v419_v41 = vrot.slane %v418_v38, 2  ;;  %v791_v42 = vsel %vm242_vm2, %v790_v39, 0.0  ;;  %v233_v21 = vpop.f32.mrf.mxu1 }
 0x254   :  { %792 = vadd.xlane.f32.xlu1 %v791_v42  ;;  %v234_v22 = vadd.f32 %v233_v21, %v1332_v18 }
 0x255   :  { %v415_v43 = vrot.slane %v414_v40, 1  ;;  %v420_v44 = vmax.f32 %v418_v38, %v419_v41 }
 0x257   :  { %v416_v45 = vmax.f32 %v414_v40, %v415_v43  ;;  %v421_v46 = vrot.slane %v420_v44, 1 }
 0x259   :  { %v423_v47 = vsub.f32 %v407_v28, %v416_v45  ;;  %v422_v48 = vmax.f32 %v420_v44, %v421_v46 }
 0x25b   :  { %v425_v49 = vmul.f32 1.442695, %v423_v47  ;;  %v424_v50 = vsub.f32 %v409_v31, %v422_v48 }
 0x25d   :  { %1138 = vpow2.f32 %v425_v49  ;;  %v427_v51 = vmul.f32 1.442695, %v424_v50 }
 0x25f   :  { %1140 = vpow2.f32 %v427_v51 }
 0x26a   :  { %v1139_v52 = vpop.eup %1138 }
 0x26b   :  { %v429_v53 = vrot.slane %v1139_v52, 4 }
 0x26c   :  { %v1141_v54 = vpop.eup %1140 }
 0x26d   :  { %v435_v55 = vrot.slane %v1141_v54, 4  ;;  %v430_v56 = vadd.f32 %v1139_v52, %v429_v53 }
 0x26f   :  { %v436_v57 = vadd.f32 %v1141_v54, %v435_v55  ;;  %v431_v58 = vrot.slane %v430_v56, 2 }
 0x271   :  { %v437_v59 = vrot.slane %v436_v57, 2  ;;  %v432_v60 = vadd.f32 %v431_v58, %v430_v56 }
 0x273   :  { %v438_v61 = vadd.f32 %v437_v59, %v436_v57  ;;  %v433_v62 = vrot.slane %v432_v60, 1 }
 0x275   :  { %v439_v63 = vrot.slane %v438_v61, 1  ;;  %v434_v0 = vadd.f32 %v433_v62, %v432_v60 }
 0x277   :  { %v440_v2 = vadd.f32 %v439_v63, %v438_v61  ;;  %1142 = vrcp.f32 %v434_v0 }
 0x279   :  { %1144 = vrcp.f32 %v440_v2 }
 0x284   :  { %v1143_v7 = vpop.eup %1142 }
 0x285   :  { %v442_v12 = vmul.f32 %v1143_v7, %v1139_v52 }
 0x286   :  { %v1145_v8 = vpop.eup %1144 }
 0x287   :  { %v444_v11 = vmul.f32 %v1145_v8, %v1141_v54 }
 0x289   :  { %488 = vmatprep.subr.mxu1 %v444_v11 }
 0x28a   :  { %489 = vmatpush1.msra.mxu1 %v442_v12 }
 0x28b   :  { %1047 = vmatmul.mubr.msk.f32.vlgmr.msra.gmra.mxu1 %vm445_vm5, %v224_v10  ;;  %1115 = vmatprep.subr.msk.mxu1 %vm51_vm1, %v1312_v25 }
 0x28c   :  { %528 = vmatprep.mubr.f32.mxu1 %v1176_v1  ;;  %1116 = vmatpush3.xpose.msk.msra.mxu1 %vm51_vm1, %v1312_v25 }
 0x28d   :  { %1061 = vmatprep.subr.msk.mxu1 %vm335_vm3, %v795_v17 }
 0x28f   :  { %1048 = vmatmul.mubr.msk.f32.gmra.mxu1 %vm445_vm5, %v229_v19 }
 0x290   :  { %534 = vmatprep.mubr.f32.mxu1 %v1176_v1 }
 0x293   :  { %1049 = vmatmul.mubr.msk.f32.gmra.mxu1 %vm445_vm5, %v234_v22 }
 0x294   :  { %540 = vmatprep.mubr.f32.mxu1 %v1176_v1 }
 0x297   :  { %1050 = vmatmul.mubr.msk.f32.gmra.mxu1 %vm445_vm5, %v239_v24 }
 0x298   :  { %1117 = vmatprep.mubr.msk.f32.mxu1 %vm51_vm1, %v1268_v14 }
 0x29b   :  { %1118 = vmatmul.mubr.msk.f32.vlgmr.msra.gmra.mxu1 %vm51_vm1, %v1273_v15 }
 0x29c   :  { %1120 = vmatprep.mubr.msk.f32.mxu1 %vm51_vm1, %v1278_v16  ;;  %1062 = vmatpush1.msk.msra.mxu1 %vm335_vm3, %v1051_v9 }
 0x29f   :  { %1121 = vmatmul.mubr.msk.f32.gmra.mxu1 %vm51_vm1, %v1295_v20 }
 0x2a0   :  { %867 = vmatprep.mubr.f32.mxu1 %v1176_v1 }
 0x2dd   :  { %v793_v35 = vpop.xlane.xlu1 %792 }
 0x311   :  { %v786_v25 = vpop.f32.mrf.mxu0 }
 0x312   :  { %1063 = vmatmul.mubr.msk.f32.vlgmr.msra.gmra.mxu1 %vm331_vm4, %v786_v25 }
 0x313   :  { %v1127_v26 = vpop.f32.mrf.mxu0 }
 0x34b   :  { %v524_v27 = vpop.f32.mrf.mxu1 }
 0x34c   :  { %547 = vst [vmem:[#allocation2] sm:$0xff] %v524_v27 }
 0x34d   :  { %v526_v14 = vpop.f32.mrf.mxu1 }
 0x34e   :  { %548 = vst [vmem:[#allocation2 + $0x8] sm:$0xff] %v526_v14 }
 0x34f   :  { %v530_v28 = vpop.f32.mrf.mxu1 }
 0x350   :  { %549 = vst [vmem:[#allocation2 + $0x10] sm:$0xff] %v530_v28 }
 0x351   :  { %v532_v15 = vpop.f32.mrf.mxu1 }
 0x352   :  { %550 = vst [vmem:[#allocation2 + $0x18] sm:$0xff] %v532_v15 }
 0x353   :  { %v536_v16 = vpop.f32.mrf.mxu1 }
 0x354   :  { %551 = vst [vmem:[#allocation2 + $0x20] sm:$0xff] %v536_v16 }
 0x355   :  { %v538_v29 = vpop.f32.mrf.mxu1 }
 0x356   :  { %552 = vst [vmem:[#allocation2 + $0x28] sm:$0xff] %v538_v29 }
 0x357   :  { %v542_v30 = vpop.f32.mrf.mxu1 }
 0x358   :  { %553 = vst [vmem:[#allocation2 + $0x30] sm:$0xff] %v542_v30 }
 0x359   :  { %v544_v20 = vpop.f32.mrf.mxu1 }
 0x35a   :  { %554 = vst [vmem:[#allocation2 + $0x38] sm:$0xff] %v544_v20 }
 0x35b   :  { %v1119_v31 = vpop.f32.mrf.mxu1 }
 0x35c   :  { %v704_v17 = vadd.f32 %v1119_v31, %v1326_v6 }
 0x35d   :  { %v698_v32 = vpop.f32.mrf.mxu1 }
 0x35e   :  { %v699_v13 = vadd.f32 %v698_v32, %v1324_v4 }
 0x35f   :  { %v1122_v33 = vpop.f32.mrf.mxu1 }
 0x360   :  { %v714_v4 = vadd.f32 %v1122_v33, %v1345_v23 }
 0x361   :  { %v708_v34 = vpop.f32.mrf.mxu1 }
 0x362   :  { %v709_v19 = vadd.f32 %v708_v34, %v1332_v18 }
 0x3d2   :  { %v869_v36 = vpop.f32.mrf.mxu1 }
 0x3d3   :  { %v870_v37 = vadd.f32 %v869_v36, %v793_v35 }
 0x3d4   :  { %v871_v38 = vpop.f32.mrf.mxu1 }
 0x3d5   :  { %v874_v39 = vrot.slane %v870_v37, 4  ;;  %v872_v40 = vadd.f32 %v871_v38, %v793_v35 }
 0x3d7   :  { %v875_v41 = vmax.f32 %v870_v37, %v874_v39  ;;  %v880_v42 = vrot.slane %v872_v40, 4 }
 0x3d9   :  { %v876_v43 = vrot.slane %v875_v41, 2  ;;  %v881_v44 = vmax.f32 %v872_v40, %v880_v42 }
 0x3db   :  { %v877_v45 = vmax.f32 %v875_v41, %v876_v43  ;;  %v882_v46 = vrot.slane %v881_v44, 2 }
 0x3dd   :  { %v878_v47 = vrot.slane %v877_v45, 1  ;;  %v883_v48 = vmax.f32 %v881_v44, %v882_v46 }
 0x3df   :  { %v879_v49 = vmax.f32 %v877_v45, %v878_v47  ;;  %v884_v50 = vrot.slane %v883_v48, 1 }
 0x3e1   :  { %v886_v51 = vsub.f32 %v870_v37, %v879_v49  ;;  %v885_v52 = vmax.f32 %v883_v48, %v884_v50 }
 0x3e3   :  { %v888_v53 = vmul.f32 1.442695, %v886_v51  ;;  %v887_v54 = vsub.f32 %v872_v40, %v885_v52 }
 0x3e5   :  { %1146 = vpow2.f32 %v888_v53  ;;  %v890_v55 = vmul.f32 1.442695, %v887_v54 }
 0x3e7   :  { %1148 = vpow2.f32 %v890_v55 }
 0x3f2   :  { %v1147_v56 = vpop.eup %1146 }
 0x3f3   :  { %v892_v57 = vrot.slane %v1147_v56, 4 }
 0x3f4   :  { %v1149_v58 = vpop.eup %1148 }
 0x3f5   :  { %v898_v59 = vrot.slane %v1149_v58, 4  ;;  %v893_v60 = vadd.f32 %v1147_v56, %v892_v57 }
 0x3f7   :  { %v899_v61 = vadd.f32 %v1149_v58, %v898_v59  ;;  %v894_v62 = vrot.slane %v893_v60, 2 }
 0x3f9   :  { %v900_v63 = vrot.slane %v899_v61, 2  ;;  %v895_v0 = vadd.f32 %v894_v62, %v893_v60 }
 0x3fb   :  { %v901_v2 = vadd.f32 %v900_v63, %v899_v61  ;;  %v896_v3 = vrot.slane %v895_v0, 1 }
 0x3fd   :  { %v902_v5 = vrot.slane %v901_v2, 1  ;;  %v897_v7 = vadd.f32 %v896_v3, %v895_v0 }
 0x3ff   :  { %v903_v8 = vadd.f32 %v902_v5, %v901_v2  ;;  %1150 = vrcp.f32 %v897_v7 }
 0x401   :  { %1152 = vrcp.f32 %v903_v8 }
 0x40c   :  { %v1151_v9 = vpop.eup %1150 }
 0x40d   :  { %v905_v12 = vmul.f32 %v1151_v9, %v1147_v56 }
 0x40e   :  { %v1153_v10 = vpop.eup %1152 }
 0x40f   :  { %v907_v11 = vmul.f32 %v1153_v10, %v1149_v58 }
 0x411   :  { %950 = vmatprep.subr.mxu0 %v907_v11 }
 0x412   :  { %951 = vmatpush1.msra.mxu0 %v905_v12 }
 0x413   :  { %1064 = vmatmul.mubr.msk.f32.vlgmr.msra.gmra.mxu0 %vm445_vm5, %v699_v13 }
 0x414   :  { %990 = vmatprep.mubr.f32.mxu0 %v1176_v1 }
 0x417   :  { %1065 = vmatmul.mubr.msk.f32.gmra.mxu0 %vm445_vm5, %v704_v17 }
 0x418   :  { %996 = vmatprep.mubr.f32.mxu0 %v1176_v1 }
 0x41b   :  { %1066 = vmatmul.mubr.msk.f32.gmra.mxu0 %vm445_vm5, %v709_v19 }
 0x41c   :  { %1002 = vmatprep.mubr.f32.mxu0 %v1176_v1 }
 0x41f   :  { %1067 = vmatmul.mubr.msk.f32.gmra.mxu0 %vm445_vm5, %v714_v4 }
 0x4d3   :  { %v986_v21 = vpop.f32.mrf.mxu0 }
 0x4d4   :  { %1010 = vst [vmem:[#allocation2 + $0x40] sm:$0xff] %v986_v21 }
 0x4d5   :  { %v988_v22 = vpop.f32.mrf.mxu0 }
 0x4d6   :  { %1011 = vst [vmem:[#allocation2 + $0x48] sm:$0xff] %v988_v22 }
 0x4d7   :  { %v992_v24 = vpop.f32.mrf.mxu0 }
 0x4d8   :  { %1012 = vst [vmem:[#allocation2 + $0x50] sm:$0xff] %v992_v24 }
 0x4d9   :  { %v994_v6 = vpop.f32.mrf.mxu0 }
 0x4da   :  { %1013 = vst [vmem:[#allocation2 + $0x58] sm:$0xff] %v994_v6 }
 0x4db   :  { %v998_v25 = vpop.f32.mrf.mxu0 }
 0x4dc   :  { %1014 = vst [vmem:[#allocation2 + $0x60] sm:$0xff] %v998_v25 }
 0x4dd   :  { %v1000_v18 = vpop.f32.mrf.mxu0 }
 0x4de   :  { %1015 = vst [vmem:[#allocation2 + $0x68] sm:$0xff] %v1000_v18 }
 0x4df   :  { %v1004_v26 = vpop.f32.mrf.mxu0 }
 0x4e0   :  { %1016 = vst [vmem:[#allocation2 + $0x70] sm:$0xff] %v1004_v26 }
 0x4e1   :  { %v1006_v1 = vpop.f32.mrf.mxu0 }
 0x4e2   :  { %1017 = vst [vmem:[#allocation2 + $0x78] sm:$0xff] %v1006_v1 }
 0x4e3   :  { %1165 = shalt.err (!%p1162_p4)
}
 0x4e4   :  { %s1180_s11 = smov 256   ;;  %s1181_s12 = smov 16  }
 0x4e5   :  { %1029 = dma.vmem_to_hbm [thread:$0]  %s1024_s10, 2048, %s1384_s8, [#allocation3], %s1180_s11, %s1180_s11, %s1181_s12  }
 0x4e6   :  { %1174 = dma.done.wait [#allocation3], 2048  }
 0x4e7   :  { %1175 = vsyncadd [#allocation3], 4294965248 }
 0x4e8   :  { %1033 = vsyncpa [#allocation3], 1 }

</bundles_post_ra>
